<compile_context>
chip_gen: v6e
topology: v6e:2x2x1
jax: 0.10.0
libtpu: 0.0.40
codegen_flags: <defaults>
</compile_context>

<pallas_src>
import functools
import math

import jax
import jax.numpy as jnp
from jax.experimental import pallas as pl
from jax.experimental.pallas import tpu as pltpu


def _round_up(x, m):
    return ((x + m - 1) // m) * m


def _vmem_limit_bytes():
    """Generation-aware scoped-VMEM request (never the full physical capacity)."""
    try:
        cap = pltpu.get_tpu_info().vmem_capacity_bytes
    except Exception:
        cap = 64 << 20  # conservative fallback: v7x per-TensorCore VMEM
    return max(32 << 20, int(cap * 0.85))


def _row_dim_semantics():
    """CORE_PARALLEL on v7x (2 TensorCores/chip); plain parallel elsewhere."""
    try:
        kind = jax.devices()[0].device_kind.lower()
    except Exception:
        kind = ""
    if "v7" in kind or "tpu7" in kind:
        return (pltpu.CORE_PARALLEL,)
    return ("parallel",)


def _trans_output_kernel(x_ref, res_ref, w_ref, b_ref, gamma_ref, beta_ref, o_ref,
                         *, eps, h_true):
    # x: (TM, K) bf16, w: (K, Hp) bf16, res/o: (TM, Hp), b/gamma/beta: (1, Hp).
    # Dense: bf16 in, f32 accumulation on the MXU.
    h = jnp.dot(x_ref[...], w_ref[...], preferred_element_type=jnp.float32)
    h = h + b_ref[...].astype(jnp.float32)

    # Dropout == identity at inference.
    # Residual add.
    h = h + res_ref[...].astype(jnp.float32)

    # TF-style LayerNorm over the *true* hidden size.  Padded columns of h are
    # exactly zero (W columns / bias / residual were zero-padded), so plain
    # sums over Hp divided by h_true give correct moments; padded outputs are
    # zeroed by gamma_pad = beta_pad = 0 and sliced off in the wrapper.
    inv_h = 1.0 / float(h_true)
    u = jnp.sum(h, axis=-1, keepdims=True) * inv_h
    s = jnp.sum(h * h, axis=-1, keepdims=True) * inv_h - u * u
    s = jnp.maximum(s, 0.0)  # guard one-pass f32 cancellation -> rsqrt(NaN)
    hn = (h - u) * jax.lax.rsqrt(s + eps)

    out = gamma_ref[...].astype(jnp.float32) * hn + beta_ref[...].astype(jnp.float32)
    o_ref[...] = out.astype(o_ref.dtype)


def trans_output(hidden_states, input_tensor, w, b, gamma, beta, *,
                 eps=1e-12, tm_max=512, matmul_dtype=jnp.bfloat16):
    """TransOutput forward (inference).

    hidden_states: (B, S, K) with K = intermediate_size
    input_tensor:  (B, S, H) with H = hidden_size
    w:             (K, H)    (transposed nn.Linear weight)
    Returns (B, S, H) in input_tensor.dtype.
    """
    B, S, K = hidden_states.shape
    H = w.shape[1]
    M = B * S
    out_dtype = input_tensor.dtype

    # --- bf16 MXU path for the two largest tensors ---------------------------
    x2 = hidden_states.reshape(M, K).astype(matmul_dtype)
    wq = w.astype(matmul_dtype)
    r2 = input_tensor.reshape(M, H)

    # --- lane-dense output: pad H (params + residual) to a multiple of 128 ---
    Hp = _round_up(H, 128)
    b2, g2, be2 = b, gamma, beta
    if Hp != H:
        wq = jnp.pad(wq, ((0, 0), (0, Hp - H)))
        r2 = jnp.pad(r2, ((0, 0), (0, Hp - H)))
        b2 = jnp.pad(b2, (0, Hp - H))
        g2 = jnp.pad(g2, (0, Hp - H))
        be2 = jnp.pad(be2, (0, Hp - H))

    bpe_x = jnp.dtype(matmul_dtype).itemsize
    bpe_w = jnp.dtype(matmul_dtype).itemsize
    bpe_r = jnp.dtype(r2.dtype).itemsize
    bpe_o = jnp.dtype(out_dtype).itemsize
    bpe_p = jnp.dtype(gamma.dtype).itemsize

    # --- TM sizing against scoped VMEM (generation-aware) --------------------
    vmem_limit = _vmem_limit_bytes()
    vmem_budget = vmem_limit - (6 << 20)  # headroom for compiler scratch
    # Pallas double-buffers EVERY input, including the resident weight/params.
    resident_bytes = 2 * (K * Hp * bpe_w + 3 * Hp * bpe_p)
    # Double-buffered per-row tiles + f32 working copies of h inside the body.
    row_bytes = 2 * (K * bpe_x + Hp * bpe_r + Hp * bpe_o) + 2 * Hp * 4
    max_rows = max(16, (vmem_budget - resident_bytes) // max(row_bytes, 1))

    tm_cap = int(min(tm_max, max_rows, _round_up(M, 16)))
    if tm_cap >= 256:
        tm = (tm_cap // 256) * 256      # v6e/v7x MXU is 2x256^2
    elif tm_cap >= 128:
        tm = (tm_cap // 128) * 128      # v5e MXU is 4x128^2
    else:
        tm = max(16, (tm_cap // 16) * 16)  # bf16 packs 2 rows per sublane

    # Ragged last block handled by Pallas (no HBM pad copy of the activations).
    grid = (pl.cdiv(M, tm),)

    cost = pl.CostEstimate(
        flops=2 * M * K * Hp + 10 * M * Hp,
        transcendentals=M,  # one rsqrt per row
        bytes_accessed=(M * K * bpe_x + M * Hp * bpe_r + M * Hp * bpe_o
                        + K * Hp * bpe_w + 3 * Hp * bpe_p),
    )

    kernel = functools.partial(_trans_output_kernel, eps=eps, h_true=H)

    out2 = pl.pallas_call(
        kernel,
        out_shape=jax.ShapeDtypeStruct((M, Hp), out_dtype),
        grid=grid,
        in_specs=[
            pl.BlockSpec((tm, K), lambda i: (i, 0)),    # hidden_states tile (bf16)
            pl.BlockSpec((tm, Hp), lambda i: (i, 0)),   # residual tile
            pl.BlockSpec((K, Hp), lambda i: (0, 0)),    # weight (resident, bf16)
            pl.BlockSpec((1, Hp), lambda i: (0, 0)),    # bias   (resident)
            pl.BlockSpec((1, Hp), lambda i: (0, 0)),    # gamma  (resident)
            pl.BlockSpec((1, Hp), lambda i: (0, 0)),    # beta   (resident)
        ],
        out_specs=pl.BlockSpec((tm, Hp), lambda i: (i, 0)),
        compiler_params=pltpu.CompilerParams(
            dimension_semantics=_row_dim_semantics(),
            vmem_limit_bytes=vmem_limit,
        ),
        cost_estimate=cost,
    )(x2, r2, wq, b2.reshape(1, Hp), g2.reshape(1, Hp), be2.reshape(1, Hp))

    return out2[:, :H].reshape(B, S, H)


if __name__ == "__main__":
    # Small config consistent with the module:
    #   intermediate_size K = 64, hidden_size H = 32, layer_norm_eps = 1e-12
    #   (tiny H only for the demo; real SETR sizes are already lane-dense).
    B, S = 2, 8
    K = 64   # intermediate_size
    H = 32   # hidden_size
    eps = 1e-12

    key = jax.random.PRNGKey(0)
    kx, kr, kw, kb = jax.random.split(key, 4)

    hidden_states = jax.random.normal(kx, (B, S, K), dtype=jnp.float32)
    input_tensor = jax.random.normal(kr, (B, S, H), dtype=jnp.float32)
    # Deterministic synthetic parameters (not a checkpoint load).
    w = jax.random.normal(kw, (K, H), dtype=jnp.float32) * (1.0 / math.sqrt(K))
    b = jax.random.normal(kb, (H,), dtype=jnp.float32) * 0.02
    gamma = jnp.ones((H,), dtype=jnp.float32)
    beta = jnp.zeros((H,), dtype=jnp.float32)

    out = trans_output(hidden_states, input_tensor, w, b, gamma, beta, eps=eps)
    jax.block_until_ready(out)

    # Pure-JAX f32 reference of the same math (dropout = identity at inference).
    # The kernel feeds the MXU in bf16 (f32 accumulation), so use bf16-level tol.
    h_ref = jnp.einsum("bsk,kh->bsh", hidden_states, w) + b + input_tensor
    u = h_ref.mean(-1, keepdims=True)
    s = ((h_ref - u) ** 2).mean(-1, keepdims=True)
    ref = gamma * ((h_ref - u) / jnp.sqrt(s + eps)) + beta

    err = float(jnp.max(jnp.abs(out - ref)))
    assert jnp.allclose(out, ref, atol=5e-2, rtol=5e-2), f"max abs err = {err}"

    print("KERNEL_OK")
</pallas_src>

<mosaic_0001>
module attributes {stable_mosaic.version = 11 : i64} {
  func.func @_trans_output_kernel(%arg0: i32, %arg1: memref<16x64xbf16, #tpu.memory_space<vmem>>, %arg2: memref<16x128xf32, #tpu.memory_space<vmem>>, %arg3: memref<64x128xbf16, #tpu.memory_space<vmem>>, %arg4: memref<1x128xf32, #tpu.memory_space<vmem>>, %arg5: memref<1x128xf32, #tpu.memory_space<vmem>>, %arg6: memref<1x128xf32, #tpu.memory_space<vmem>>, %arg7: memref<16x128xf32, #tpu.memory_space<vmem>>) attributes {dimension_semantics = [#tpu.dimension_semantics<parallel>], iteration_bounds = array<i64: 1>, scalar_prefetch = 0 : i64, scratch_operands = 0 : i64, tpu.core_type = #tpu.core_type<tc>, window_params = [{transform_indices = @transform_0, window_bounds = array<i64: 16, 64>}, {transform_indices = @transform_1, window_bounds = array<i64: 16, 128>}, {pipeline_mode = #tpu.pipeline_mode<synchronous>, transform_indices = @transform_2, window_bounds = array<i64: 64, 128>}, {pipeline_mode = #tpu.pipeline_mode<synchronous>, transform_indices = @transform_3, window_bounds = array<i64: 1, 128>}, {pipeline_mode = #tpu.pipeline_mode<synchronous>, transform_indices = @transform_4, window_bounds = array<i64: 1, 128>}, {pipeline_mode = #tpu.pipeline_mode<synchronous>, transform_indices = @transform_5, window_bounds = array<i64: 1, 128>}, {transform_indices = @transform_6, window_bounds = array<i64: 16, 128>}]} {
    %c0 = arith.constant 0 : index
    %c0_0 = arith.constant 0 : index
    %0 = vector.load %arg1[%c0, %c0_0] : memref<16x64xbf16, #tpu.memory_space<vmem>>, vector<16x64xbf16>
    %c0_1 = arith.constant 0 : index
    %c0_2 = arith.constant 0 : index
    %1 = vector.load %arg3[%c0_1, %c0_2] : memref<64x128xbf16, #tpu.memory_space<vmem>>, vector<64x128xbf16>
    %cst = arith.constant dense<0.000000e+00> : vector<16x128xf32>
    %2 = tpu.matmul %0, %1, %cst {dimension_numbers = #tpu.dot_dimension_numbers<[1], [0], [0], [1], [0, 0, 1, 1], [], []>} : vector<16x64xbf16>, vector<64x128xbf16>, vector<16x128xf32> -> vector<16x128xf32>
    %c0_3 = arith.constant 0 : index
    %c0_4 = arith.constant 0 : index
    %3 = vector.load %arg4[%c0_3, %c0_4] : memref<1x128xf32, #tpu.memory_space<vmem>>, vector<1x128xf32>
    %4 = vector.broadcast %3 : vector<1x128xf32> to vector<16x128xf32>
    %5 = arith.addf %2, %4 : vector<16x128xf32>
    %c0_5 = arith.constant 0 : index
    %c0_6 = arith.constant 0 : index
    %6 = vector.load %arg2[%c0_5, %c0_6] : memref<16x128xf32, #tpu.memory_space<vmem>>, vector<16x128xf32>
    %7 = arith.addf %5, %6 : vector<16x128xf32>
    %cst_7 = arith.constant dense<0.000000e+00> : vector<16xf32>
    %8 = vector.multi_reduction <add>, %7, %cst_7 [1] : vector<16x128xf32> to vector<16xf32>
    %9 = vector.shape_cast %8 : vector<16xf32> to vector<16x1xf32>
    %cst_8 = arith.constant 3.125000e-02 : f32
    %10 = vector.broadcast %cst_8 : f32 to vector<16x1xf32>
    %11 = arith.mulf %9, %10 : vector<16x1xf32>
    %12 = arith.mulf %7, %7 : vector<16x128xf32>
    %cst_9 = arith.constant dense<0.000000e+00> : vector<16xf32>
    %13 = vector.multi_reduction <add>, %12, %cst_9 [1] : vector<16x128xf32> to vector<16xf32>
    %14 = vector.shape_cast %13 : vector<16xf32> to vector<16x1xf32>
    %cst_10 = arith.constant 3.125000e-02 : f32
    %15 = vector.broadcast %cst_10 : f32 to vector<16x1xf32>
    %16 = arith.mulf %14, %15 : vector<16x1xf32>
    %17 = arith.mulf %11, %11 : vector<16x1xf32>
    %18 = arith.subf %16, %17 : vector<16x1xf32>
    %cst_11 = arith.constant 0.000000e+00 : f32
    %19 = vector.broadcast %cst_11 : f32 to vector<16x1xf32>
    %20 = arith.maximumf %18, %19 : vector<16x1xf32>
    %21 = vector.broadcast %11 : vector<16x1xf32> to vector<16x128xf32>
    %22 = arith.subf %7, %21 : vector<16x128xf32>
    %cst_12 = arith.constant 9.99999996E-13 : f32
    %23 = vector.broadcast %cst_12 : f32 to vector<16x1xf32>
    %24 = arith.addf %20, %23 : vector<16x1xf32>
    %25 = math.rsqrt %24 : vector<16x1xf32>
    %26 = vector.broadcast %25 : vector<16x1xf32> to vector<16x128xf32>
    %27 = arith.mulf %22, %26 : vector<16x128xf32>
    %c0_13 = arith.constant 0 : index
    %c0_14 = arith.constant 0 : index
    %28 = vector.load %arg5[%c0_13, %c0_14] : memref<1x128xf32, #tpu.memory_space<vmem>>, vector<1x128xf32>
    %29 = vector.broadcast %28 : vector<1x128xf32> to vector<16x128xf32>
    %30 = arith.mulf %29, %27 : vector<16x128xf32>
    %c0_15 = arith.constant 0 : index
    %c0_16 = arith.constant 0 : index
    %31 = vector.load %arg6[%c0_15, %c0_16] : memref<1x128xf32, #tpu.memory_space<vmem>>, vector<1x128xf32>
    %32 = vector.broadcast %31 : vector<1x128xf32> to vector<16x128xf32>
    %33 = arith.addf %30, %32 : vector<16x128xf32>
    %c0_17 = arith.constant 0 : index
    %c0_18 = arith.constant 0 : index
    %34 = vector.load %arg7[%c0_17, %c0_18] : memref<16x128xf32, #tpu.memory_space<vmem>>, vector<16x128xf32>
    tpu.vector_store %arg7[%c0_17, %c0_18], %33 {strides = array<i32>} : memref<16x128xf32, #tpu.memory_space<vmem>>, vector<16x128xf32>,
    return
  }
  func.func @transform_0(%arg0: i32) -> (i32, i32) {
    %c0_i32 = arith.constant 0 : i32
    %c0_i32_0 = arith.constant 0 : i32
    return %arg0, %c0_i32 : i32, i32
  }
  func.func @transform_1(%arg0: i32) -> (i32, i32) {
    %c0_i32 = arith.constant 0 : i32
    %c0_i32_0 = arith.constant 0 : i32
    return %arg0, %c0_i32 : i32, i32
  }
  func.func @transform_2(%arg0: i32) -> (i32, i32) {
    %c0_i32 = arith.constant 0 : i32
    %c0_i32_0 = arith.constant 0 : i32
    %c0_i32_1 = arith.constant 0 : i32
    return %c0_i32, %c0_i32_0 : i32, i32
  }
  func.func @transform_3(%arg0: i32) -> (i32, i32) {
    %c0_i32 = arith.constant 0 : i32
    %c0_i32_0 = arith.constant 0 : i32
    %c0_i32_1 = arith.constant 0 : i32
    return %c0_i32, %c0_i32_0 : i32, i32
  }
  func.func @transform_4(%arg0: i32) -> (i32, i32) {
    %c0_i32 = arith.constant 0 : i32
    %c0_i32_0 = arith.constant 0 : i32
    %c0_i32_1 = arith.constant 0 : i32
    return %c0_i32, %c0_i32_0 : i32, i32
  }
  func.func @transform_5(%arg0: i32) -> (i32, i32) {
    %c0_i32 = arith.constant 0 : i32
    %c0_i32_0 = arith.constant 0 : i32
    %c0_i32_1 = arith.constant 0 : i32
    return %c0_i32, %c0_i32_0 : i32, i32
  }
  func.func @transform_6(%arg0: i32) -> (i32, i32) {
    %c0_i32 = arith.constant 0 : i32
    %c0_i32_0 = arith.constant 0 : i32
    return %arg0, %c0_i32 : i32, i32
  }
}

</mosaic_0001>

<bundles_post_ra>
// kernel: tpu_custom_call.1
= control target key start
LH: loop header
LB: loop body
LE: loop exit
PB: predicated region body
PF: predicated region fallthrough
CT: control target
= control target key end

     0   :  { %11 = vsyncpa [#allocation3], 0  ;;  %s430_s0 = inlined_call_operand.hbm [shape: bf16[16,64], index: 0, kind: input, shape index: {}]   ;;  %s431_s1 = inlined_call_operand.hbm [shape: f32[16,128], index: 1, kind: input, shape index: {}]   ;;  %s432_s2 = inlined_call_operand.hbm [shape: bf16[64,128], index: 2, kind: input, shape index: {}]   ;;  %s433_s3 = inlined_call_operand.vmem [shape: f32[1,128], index: 3, kind: input, shape index: {}]   ;;  %s434_s4 = inlined_call_operand.vmem [shape: f32[1,128], index: 4, kind: input, shape index: {}]   ;;  %s435_s5 = inlined_call_operand.vmem [shape: f32[1,128], index: 5, kind: input, shape index: {}]   ;;  %s436_s6 = inlined_call_operand.hbm [shape: f32[16,128], index: 6, kind: output, shape index: {}]  }
   0x1   :  { %12 = vsyncpa [#allocation6], 0 }
   0x2   :  { %13 = vsyncpa [#allocation4], 0  ;;  %s358_s21 = smov [#allocation5]  }
   0x3   :  { %s31_s22 = sshll.u32 %s358_s21, 4  ;;  %s32_s22 = int_to_ptr.vmem [resolvable:$true] %s31_s22 }
   0x4   :  { %s280_s23 = scalar_lea.vmem %s32_s22, 256  ;;  %p285_p1 = scmp.lt.s32.totalorder %s32_s22, %s32_s22 }
   0x5   :  { %p281_p0 = scmp.ne.s32.totalorder %s32_s22, %s280_s23  ;;  %p286_p2 = scmp.lt.s32.totalorder %s280_s23, %s280_s23 }
   0x7   :  { %p287_p3 = por %p286_p2, %p285_p1 }
   0x9   :  { %p288_p4 = pnand %p287_p3, %p281_p0 }
   0xb   :  { %291 = shalt.err (!%p288_p4)
}
   0xc   :  { %s359_s24 = smov 128   ;;  %s360_s25 = smov 8  }
   0xd   :  { %37 = dma.hbm_to_vmem [thread:$0]  %s431_s1, 256, %s32_s22, [#allocation6], %s359_s24, %s359_s24, %s360_s25  }
   0xe   :  { %s361_s28 = smov [#allocation2]  }
   0xf   :  { %s19_s29 = sshll.u32 %s361_s28, 4  ;;  %s20_s29 = int_to_ptr.vmem [resolvable:$true] %s19_s29 }
  0x10   :  { %s300_s30 = scalar_lea.vmem %s20_s29, 128  ;;  %p305_p6 = scmp.lt.s32.totalorder %s20_s29, %s20_s29 }
  0x11   :  { %p301_p5 = scmp.ne.s32.totalorder %s20_s29, %s300_s30  ;;  %p306_p7 = scmp.lt.s32.totalorder %s300_s30, %s300_s30 }
  0x13   :  { %p307_p8 = por %p306_p7, %p305_p6 }
  0x15   :  { %p308_p9 = pnand %p307_p8, %p301_p5 }
  0x17   :  { %311 = shalt.err (!%p308_p9)
}
  0x18   :  { %s362_s7 = smov 64   ;;  %s363_s8 = smov 4  }
  0x19   :  { %25 = dma.hbm_to_vmem [thread:$0]  %s430_s0, 128, %s20_s29, [#allocation3], %s362_s7, %s362_s7, %s363_s8  }
  0x1a   :  { %s364_s11 = smov [#allocation7]  }
  0x1b   :  { %s43_s12 = sshll.u32 %s364_s11, 4  ;;  %s44_s12 = int_to_ptr.vmem [resolvable:$true] %s43_s12 }
  0x1c   :  { %s320_s1 = scalar_lea.vmem %s44_s12, 512  ;;  %p325_p11 = scmp.lt.s32.totalorder %s44_s12, %s44_s12 }
  0x1d   :  { %p321_p10 = scmp.ne.s32.totalorder %s44_s12, %s320_s1  ;;  %p326_p12 = scmp.lt.s32.totalorder %s320_s1, %s320_s1 }
  0x1f   :  { %p327_p13 = por %p326_p12, %p325_p11 }
  0x21   :  { %p328_p0 = pnand %p327_p13, %p321_p10 }
  0x23   :  { %331 = shalt.err (!%p328_p0)
}
  0x24   :  { %49 = dma.hbm_to_vmem [thread:$0]  %s432_s2, 512, %s44_s12, [#allocation6], %s362_s7, %s362_s7, %s363_s8  }
  0x25   :  { %352 = dma.done.wait [#allocation3], 128  }
  0x26   :  { %353 = vsyncadd [#allocation3], 4294967168 }
  0x27   :  { %354 = dma.done.wait [#allocation6], 768  }
  0x28   :  { %355 = vsyncadd [#allocation6], 4294966528  ;;  %v365_v0 = vmov 0.0   ;;  %vm366_vm0 = vmmov 0   ;;  %v263_v1 = vld [vmem:[#allocation7 + $0x18] sm:$0xff]   ;;  %v264_v2 = vld [vmem:[#allocation7 + $0x10] sm:$0xff]  }
  0x29   :  { %241 = vmatprep.subr.bf16.mxu0 %v365_v0  ;;  %249 = vmatprep.mubr.msk.bf16.mxu0 %vm366_vm0, %v365_v0  ;;  %v265_v3 = vld [vmem:[#allocation7 + $0x8] sm:$0xff]   ;;  %v266_v4 = vld [vmem:[#allocation7] sm:$0xff]   ;;  %vm112_vm1 = vcmask 523264   ;;  %v157_v8 = vld [vmem:[#allocation5] sm:$0xff]  ;;  %s367_s18 = smov [#allocation8]  }
  0x2a   :  { %242 = vmatpush3.bf16.msra.mxu0 %v263_v1  ;;  %v267_v5 = vld [vmem:[#allocation2] sm:$0xff]   ;;  %v158_v13 = vld [vmem:[#allocation5 + $0x8] sm:$0xff]  ;;  %s214_s19 = sshll.u32 %s367_s18, 4  ;;  %s215_s19 = int_to_ptr.vmem [resolvable:$true] %s214_s19 }
  0x2b   :  { %243 = vmatprep.subr.bf16.mxu0 %v365_v0  ;;  %v227_v6 = vld [vmem:[%s433_s3] ss:$0 sm:$0xff]  ;;  %s332_s20 = scalar_lea.vmem %s215_s19, 256  ;;  %p337_p2 = scmp.lt.s32.totalorder %s215_s19, %s215_s19 }
  0x2c   :  { %v234_v37 = vld [vmem:[%s434_s4] ss:$0 sm:$0xff]  ;;  %p333_p1 = scmp.ne.s32.totalorder %s215_s19, %s332_s20  ;;  %p338_p3 = scmp.lt.s32.totalorder %s332_s20, %s332_s20 }
  0x2d   :  { %v235_v39 = vld [vmem:[%s435_s5] ss:$0 sm:$0xff] }
  0x2e   :  { %244 = vmatpush3.bf16.msra.mxu0 %v264_v2  ;;  %p339_p4 = por %p338_p3, %p337_p2 }
  0x2f   :  { %245 = vmatprep.subr.bf16.mxu0 %v365_v0 }
  0x30   :  { %p340_p5 = pnand %p339_p4, %p333_p1 }
  0x32   :  { %246 = vmatpush3.bf16.msra.mxu0 %v265_v3 }
  0x33   :  { %247 = vmatprep.subr.bf16.mxu0 %v365_v0 }
  0x36   :  { %248 = vmatpush3.bf16.msra.mxu0 %v266_v4 }
  0x39   :  { %250 = vmatmul.mubr.msk.bf16.vlgmr.msra.gmra.mxu0 %vm112_vm1, %v267_v5 }
  0xf9   :  { %v150_v7 = vpop.f32.mrf.mxu0 }
  0xfa   :  { %v151_v9 = vadd.f32 %v227_v6, %v150_v7 }
  0xfb   :  { %v251_v10 = vpop.f32.mrf.mxu0 }
  0xfc   :  { %v159_v11 = vadd.f32 %v157_v8, %v151_v9 }
  0xfd   :  { %v153_v12 = vpop.f32.mrf.mxu0 }
  0xfe   :  { %v154_v14 = vadd.f32 %v227_v6, %v153_v12  ;;  %161 = vadd.xlane.f32.xlu0 %v159_v11  ;;  %v167_v15 = vmul.f32 %v159_v11, %v159_v11 }
  0xff   :  { %v252_v16 = vpop.f32.mrf.mxu0 }
 0x100   :  { %v160_v17 = vadd.f32 %v158_v13, %v154_v14  ;;  %169 = vadd.xlane.f32.xlu1 %v167_v15 }
 0x102   :  { %163 = vadd.xlane.f32.xlu0 %v160_v17  ;;  %v168_v18 = vmul.f32 %v160_v17, %v160_v17 }
 0x104   :  { %171 = vadd.xlane.f32.xlu1 %v168_v18 }
 0x187   :  { %v162_v19 = vpop.xlane.xlu0 %161 }
 0x188   :  { %v165_v20 = vmul.f32 0.03125, %v162_v19 }
 0x189   :  { %v170_v21 = vpop.xlane.xlu1 %169 }
 0x18a   :  { %v175_v22 = vmul.f32 %v165_v20, %v165_v20  ;;  %v173_v23 = vmul.f32 0.03125, %v170_v21  ;;  %v181_v35 = vsub.f32 %v159_v11, %v165_v20 }
 0x18b   :  { %v164_v24 = vpop.xlane.xlu0 %163 }
 0x18c   :  { %v177_v25 = vsub.f32 %v173_v23, %v175_v22  ;;  %v166_v26 = vmul.f32 0.03125, %v164_v24 }
 0x18d   :  { %v172_v27 = vpop.xlane.xlu1 %171 }
 0x18e   :  { %v179_v28 = vmax.f32 %v177_v25, 0.0  ;;  %v176_v29 = vmul.f32 %v166_v26, %v166_v26  ;;  %v174_v30 = vmul.f32 0.03125, %v172_v27  ;;  %v182_v40 = vsub.f32 %v160_v17, %v166_v26 }
 0x190   :  { %v183_v31 = vadd.f32 1e-12, %v179_v28  ;;  %v178_v32 = vsub.f32 %v174_v30, %v176_v29 }
 0x192   :  { %268 = vrsqrt.f32 %v183_v31  ;;  %v180_v33 = vmax.f32 %v178_v32, 0.0 }
 0x194   :  { %v184_v34 = vadd.f32 1e-12, %v180_v33 }
 0x196   :  { %270 = vrsqrt.f32 %v184_v34 }
 0x19f   :  { %v269_v36 = vpop.eup %268 }
 0x1a0   :  { %v187_v38 = vmul.f32 %v269_v36, %v181_v35 }
 0x1a2   :  { %v196_v41 = vmul.f32 %v234_v37, %v187_v38 }
 0x1a3   :  { %v271_v42 = vpop.eup %270 }
 0x1a4   :  { %v188_v43 = vmul.f32 %v271_v42, %v182_v40  ;;  %v205_v44 = vadd.f32 %v235_v39, %v196_v41 }
 0x1a6   :  { %v197_v45 = vmul.f32 %v234_v37, %v188_v43  ;;  %207 = vst [vmem:[#allocation8] sm:$0xff] %v205_v44 }
 0x1a8   :  { %v206_v46 = vadd.f32 %v235_v39, %v197_v45 }
 0x1aa   :  { %208 = vst [vmem:[#allocation8 + $0x8] sm:$0xff] %v206_v46 }
 0x1ab   :  { %343 = shalt.err (!%p340_p5)
}
 0x1ac   :  { %220 = dma.vmem_to_hbm [thread:$0]  %s215_s19, 256, %s436_s6, [#allocation4], %s359_s24, %s359_s24, %s360_s25  }
 0x1ad   :  { %356 = dma.done.wait [#allocation4], 256  }
 0x1ae   :  { %357 = vsyncadd [#allocation4], 4294967040 }
 0x1af   :  { %224 = vsyncpa [#allocation3], 1 }
 0x1b0   :  { %225 = vsyncpa [#allocation6], 1 }
 0x1b1   :  { %226 = vsyncpa [#allocation4], 1 }

</bundles_post_ra>
